<compile_context>
chip_gen: v6e
topology: v6e:2x2x1
jax: 0.10.0
libtpu: 0.0.40
codegen_flags: <defaults>
</compile_context>

<pallas_src>
import jax
import jax.numpy as jnp
from jax.experimental import pallas as pl
from jax.experimental.pallas import tpu as pltpu

_LANE = 128
_SUBLANE = 8
# Padded per-pipeline-buffer VMEM budget.  Each of the in/out blocks is
# double-buffered by the Pallas pipeline, so resident footprint ~= 4x this.
_PER_BUFFER_BYTES = 1 << 20          # 1 MiB -> ~4 MiB total (softmax path)
# Lane tile for the flat elementwise path (multiple of 128). 64K f32 lanes is
# 256 KiB of real data per block; even with worst-case (8,128) sublane padding
# of the (1, L) view that is <= 2 MiB per buffer (~8 MiB total).
_FLAT_TILE_LANES = 64 * 1024


def _round_up(x: int, m: int) -> int:
    return ((x + m - 1) // m) * m


def _round_down(x: int, m: int) -> int:
    return (x // m) * m


def _scale_kernel(inv_t_ref, z_ref, o_ref):
    """Lane-dense (1, tile_len) block of the flattened logits: Z * (1/T)."""
    inv_t = inv_t_ref[0, 0]
    o_ref[...] = (z_ref[...] * inv_t).astype(o_ref.dtype)


def _scale_softmax_kernel(inv_t_ref, z_ref, o_ref):
    """(tile_n, C) block: scale by 1/T, softmax over the class (lane) axis.

    OOB rows of a ragged boundary block may compute NaN/Inf, but softmax is
    strictly per-row and Pallas masks their writes, so valid rows are safe.
    """
    inv_t = inv_t_ref[0, 0]
    z = z_ref[...].astype(jnp.float32) * inv_t
    m = jnp.max(z, axis=-1, keepdims=True)        # per-sample max over classes
    e = jnp.exp(z - m)
    s = jnp.sum(e, axis=-1, keepdims=True)
    o_ref[...] = (e * pl.reciprocal(s, approx=False)).astype(o_ref.dtype)


def temperature_scaling(Z, T, apply_softmax: bool = False):
    """Pallas forward of TemperatureScaling. Z: (N, C), T: scalar parameter."""
    N, C = Z.shape
    inv_t = (1.0 / jnp.asarray(T, dtype=jnp.float32)).reshape(1, 1)
    itemsize = jnp.dtype(Z.dtype).itemsize
    smem_spec = pl.BlockSpec(memory_space=pltpu.MemorySpace.SMEM)  # 1/T scalar

    if not apply_softmax:
        # Elementwise path: free bitcast-reshape to a lane-dense (1, N*C) view.
        L = N * C
        Zf = Z.reshape(1, L)
        tile_len = L if L <= _FLAT_TILE_LANES else _FLAT_TILE_LANES
        grid = (pl.cdiv(L, tile_len),)
        out = pl.pallas_call(
            _scale_kernel,
            out_shape=jax.ShapeDtypeStruct((1, L), Z.dtype),
            grid=grid,
            in_specs=[smem_spec, pl.BlockSpec((1, tile_len), lambda i: (0, i))],
            out_specs=pl.BlockSpec((1, tile_len), lambda i: (0, i)),
            compiler_params=pltpu.CompilerParams(
                dimension_semantics=("parallel",)),
        )(inv_t, Zf)
        return out.reshape(N, C)

    # Softmax path: (tile_n, C) blocks straight from the original (N, C) array.
    # Padding-aware VMEM sizing: the class axis is lane-padded to 128 in VMEM.
    lanes = _round_up(C, _LANE)
    cap = max(_SUBLANE,
              _round_down(_PER_BUFFER_BYTES // (lanes * itemsize), _SUBLANE))
    tile_n = N if N <= cap else cap              # ragged tail via boundary block
    grid = (pl.cdiv(N, tile_n),)
    # TODO(synk): very wide C (>~ a few K classes) would also need class-axis
    # tiling with an online-softmax accumulator; NLI-style C is tiny.
    return pl.pallas_call(
        _scale_softmax_kernel,
        out_shape=jax.ShapeDtypeStruct((N, C), Z.dtype),
        grid=grid,
        in_specs=[smem_spec, pl.BlockSpec((tile_n, C), lambda i: (i, 0))],
        out_specs=pl.BlockSpec((tile_n, C), lambda i: (i, 0)),
        compiler_params=pltpu.CompilerParams(
            dimension_semantics=("parallel",)),
    )(inv_t, Z)


if __name__ == "__main__":
    key = jax.random.PRNGKey(0)

    # Deterministic parameter init, as in the module's __init__.
    T = jnp.float32(10.0)

    # NLI-style logits: batch=8, 3 classes (entail / neutral / contradict).
    N, C = 8, 3
    Z = jax.random.normal(key, (N, C), dtype=jnp.float32) * 5.0

    # Path 1: plain temperature scaling (apply_softmax=False).
    out_scaled = jax.block_until_ready(temperature_scaling(Z, T, apply_softmax=False))
    ref_scaled = Z / T
    assert out_scaled.shape == (N, C)
    assert jnp.allclose(out_scaled, ref_scaled, atol=1e-6, rtol=1e-6)

    # Path 2: calibrated probabilities (apply_softmax=True), softmax over dim=1.
    out_probs = jax.block_until_ready(temperature_scaling(Z, T, apply_softmax=True))
    ref_probs = jax.nn.softmax(Z / T, axis=1)
    assert jnp.allclose(out_probs, ref_probs, atol=1e-6, rtol=1e-5)

    # Ragged batch (single block, tile == N, not a multiple of 8).
    N2 = 300
    Z2 = jax.random.normal(jax.random.PRNGKey(1), (N2, C), dtype=jnp.float32) * 5.0
    out2 = jax.block_until_ready(temperature_scaling(Z2, T, apply_softmax=True))
    ref2 = jax.nn.softmax(Z2 / T, axis=1)
    assert out2.shape == (N2, C)
    assert jnp.allclose(out2, ref2, atol=1e-6, rtol=1e-5)

    # Larger ragged batch: exercises the multi-step grid (cdiv(2500, 2048) = 2)
    # and the masked boundary block on both paths.
    N3 = 2500
    Z3 = jax.random.normal(jax.random.PRNGKey(2), (N3, C), dtype=jnp.float32) * 5.0
    out3p = jax.block_until_ready(temperature_scaling(Z3, T, apply_softmax=True))
    assert jnp.allclose(out3p, jax.nn.softmax(Z3 / T, axis=1), atol=1e-6, rtol=1e-5)
    out3s = jax.block_until_ready(temperature_scaling(Z3, T, apply_softmax=False))
    assert jnp.allclose(out3s, Z3 / T, atol=1e-6, rtol=1e-6)

    print("KERNEL_OK")
</pallas_src>

<mosaic_0001>
module attributes {stable_mosaic.version = 11 : i64} {
  func.func @_scale_kernel(%arg0: i32, %arg1: memref<1x1xf32, #tpu.memory_space<smem>>, %arg2: memref<1x24xf32, #tpu.memory_space<vmem>>, %arg3: memref<1x24xf32, #tpu.memory_space<vmem>>) attributes {dimension_semantics = [#tpu.dimension_semantics<parallel>], iteration_bounds = array<i64: 1>, scalar_prefetch = 0 : i64, scratch_operands = 0 : i64, tpu.core_type = #tpu.core_type<tc>, window_params = [{transform_indices = @transform_0, window_bounds = array<i64: 1, 1>}, {transform_indices = @transform_1, window_bounds = array<i64: 1, 24>}, {transform_indices = @transform_2, window_bounds = array<i64: 1, 24>}]} {
    %c0 = arith.constant 0 : index
    %c0_0 = arith.constant 0 : index
    %0 = memref.load %arg1[%c0, %c0_0] : memref<1x1xf32, #tpu.memory_space<smem>>
    %c0_1 = arith.constant 0 : index
    %c0_2 = arith.constant 0 : index
    %1 = vector.load %arg2[%c0_1, %c0_2] : memref<1x24xf32, #tpu.memory_space<vmem>>, vector<1x24xf32>
    %2 = vector.broadcast %0 : f32 to vector<1x24xf32>
    %3 = arith.mulf %1, %2 : vector<1x24xf32>
    %c0_3 = arith.constant 0 : index
    %c0_4 = arith.constant 0 : index
    %4 = vector.load %arg3[%c0_3, %c0_4] : memref<1x24xf32, #tpu.memory_space<vmem>>, vector<1x24xf32>
    tpu.vector_store %arg3[%c0_3, %c0_4], %3 {strides = array<i32>} : memref<1x24xf32, #tpu.memory_space<vmem>>, vector<1x24xf32>,
    return
  }
  func.func @transform_0(%arg0: i32) -> (i32, i32) {
    %c0_i32 = arith.constant 0 : i32
    %c0_i32_0 = arith.constant 0 : i32
    %c0_i32_1 = arith.constant 0 : i32
    return %c0_i32, %c0_i32_0 : i32, i32
  }
  func.func @transform_1(%arg0: i32) -> (i32, i32) {
    %c0_i32 = arith.constant 0 : i32
    %c0_i32_0 = arith.constant 0 : i32
    return %c0_i32, %arg0 : i32, i32
  }
  func.func @transform_2(%arg0: i32) -> (i32, i32) {
    %c0_i32 = arith.constant 0 : i32
    %c0_i32_0 = arith.constant 0 : i32
    return %c0_i32, %arg0 : i32, i32
  }
}

</mosaic_0001>

<bundles_post_ra>
// kernel: tpu_custom_call.1
= control target key start
LH: loop header
LB: loop body
LE: loop exit
PB: predicated region body
PF: predicated region fallthrough
CT: control target
= control target key end

     0   :  { %vm17_vm0 = vcmask 188416   ;;  %s81_s0 = inlined_call_operand.<no memory space> [shape: f32[1,1], index: 0, kind: input, shape index: {}]   ;;  %s82_s1 = inlined_call_operand.vmem [shape: f32[1,24], index: 1, kind: input, shape index: {}]   ;;  %s83_s2 = inlined_call_operand.hbm [shape: f32[1,24], index: 2, kind: output, shape index: {}]  }
   0x1   :  { %v14_v0 = vld [vmem:[%s82_s1] sm:$0x1]  ;;  %v15_v1 = vstv %s81_s0 }
   0x2   :  { %8 = vsyncpa [#allocation4], 0  ;;  %v16_v2 = vmul.f32 %v15_v1, %v14_v0  ;;  %s56_s13 = smov [#allocation3]  }
   0x3   :  { %s25_s14 = sshll.u32 %s56_s13, 4  ;;  %s26_s14 = int_to_ptr.vmem [resolvable:$true] %s25_s14 }
   0x4   :  { %18 = vst.msk [vmem:[#allocation3] sm:$0x1] %vm17_vm0, %v16_v2  ;;  %s34_s15 = scalar_lea.vmem %s26_s14, 16  ;;  %s38_s16 = scalar_lea.vmem %s26_s14, 32 }
   0x5   :  { %p35_p0 = scmp.ne.s32.totalorder %s26_s14, %s34_s15  ;;  %p39_p1 = scmp.lt.s32.totalorder %s26_s14, %s26_s14 }
   0x6   :  { %p40_p2 = scmp.lt.s32.totalorder %s38_s16, %s34_s15 }
   0x8   :  { %p41_p3 = por %p40_p2, %p39_p1 }
   0xa   :  { %p42_p4 = pnand %p41_p3, %p35_p0 }
   0xc   :  { %45 = shalt.err (!%p42_p4)
}
   0xd   :  { %28 = dma.vmem_to_hbm [thread:$0]  %s26_s14, 16, %s83_s2, [#allocation4]  }
   0xe   :  { %54 = dma.done.wait [#allocation4], 16  }
   0xf   :  { %55 = vsyncadd [#allocation4], 4294967280 }
  0x10   :  { %32 = vsyncpa [#allocation4], 1 }

</bundles_post_ra>
